<compile_context>
chip_gen: v7x
topology: tpu7x:2x2x1
jax: 0.10.0
libtpu: 0.0.40
codegen_flags: <defaults>
</compile_context>

<pallas_src>
import functools
import math

import jax
import jax.numpy as jnp
from jax.experimental import pallas as pl
from jax.experimental.pallas import tpu as pltpu


# ---------------------------------------------------------------------------
# Kernels
# ---------------------------------------------------------------------------
def _rmsnorm_kernel(x_ref, w_ref, o_ref, *, eps, low_precision_tail):
    # x_ref: (tile_rows, n_embd), w_ref: (1, n_embd), o_ref: (tile_rows, n_embd)
    x32 = x_ref[...].astype(jnp.float32)
    ms = jnp.mean(x32 * x32, axis=-1, keepdims=True)   # (tile_rows, 1), f32
    inv = jax.lax.rsqrt(ms + eps)                       # EUP rsqrt (free slot)
    if low_precision_tail:
        # bf16 VALU path (v6e/v7x): reduction stays f32, elementwise tail in
        # the input dtype -> half the live vreg/VMEM footprint of the tail.
        o_ref[...] = (x_ref[...] * inv.astype(x_ref.dtype)
                      * w_ref[...].astype(x_ref.dtype)).astype(o_ref.dtype)
    else:
        o_ref[...] = (x32 * inv * w_ref[...].astype(jnp.float32)).astype(o_ref.dtype)


def _rmsnorm_packed_kernel(x_ref, w_ref, b_ref, o_ref, *, eps):
    # Lane-dense path for n_embd < 128: g = 128 // n_embd logical rows are
    # packed into one 128-lane row.  b_ref is the (W, W) block-diagonal
    # averaging matrix, so one MXU matmul yields mean(x^2) per segment already
    # broadcast to every lane of that segment (MXU is otherwise idle here).
    x = x_ref[...].astype(jnp.float32)
    ms = jnp.dot(x * x, b_ref[...], preferred_element_type=jnp.float32)
    inv = jax.lax.rsqrt(ms + eps)
    o_ref[...] = (x * inv * w_ref[...].astype(jnp.float32)).astype(o_ref.dtype)


# ---------------------------------------------------------------------------
# Sizing helpers
# ---------------------------------------------------------------------------
def _round_up(x, m):
    return ((x + m - 1) // m) * m


def _vmem_budget():
    """(working-set budget, scoped-limit ceiling), generation aware."""
    try:
        cap = int(pltpu.get_tpu_info().vmem_capacity_bytes)
    except Exception:
        cap = 64 * 1024 * 1024   # conservative fallback: v7x per-TC VMEM
    budget = max(8 << 20, min(48 << 20, int(cap * 0.4)))
    ceiling = min(48 << 20, int(cap * 0.6))
    return budget, ceiling


def _has_bf16_valu():
    try:
        kind = jax.devices()[0].device_kind.lower()
    except Exception:
        return False
    return ("v6" in kind) or ("v7" in kind)


def _pick_tile_rows(rows, row_width, itemsize, budget):
    """Largest sublane-aligned row tile fitting the VMEM budget, while aiming
    for >= ~8 balanced grid steps when each step still moves a few MiB."""
    mult = max(8, 32 // itemsize)            # sublane packing: 8 f32 / 16 bf16 / 32 i8
    if rows <= mult:
        return rows                          # block == full array extent (allowed)
    # True per-row footprint: double-buffered in+out blocks in the input dtype
    # plus the in-kernel f32 temps (upcast x, x*x, product chain).
    per_row = 4 * row_width * itemsize + 3 * row_width * 4
    t = max(mult, budget // max(per_row, 1))
    # Prefer >= ~8 roughly equal steps (v7x 2-TC balance + pipeline ramp) as
    # long as each block still carries >= ~2 MiB of in+out HBM traffic so the
    # ~0.35 us/step overhead stays negligible.
    min_rows_for_traffic = pl.cdiv(2 * 1024 * 1024, max(2 * row_width * itemsize, 1))
    target = _round_up(pl.cdiv(rows, 8), mult)
    if target >= min_rows_for_traffic:
        t = min(t, target)
    t = max(mult, (t // mult) * mult)        # stay sublane-aligned after all caps
    return min(t, _round_up(rows, mult))


# ---------------------------------------------------------------------------
# Wrapper
# ---------------------------------------------------------------------------
def rmsnorm(x, weight, *, eps=1e-5, tile_rows=None):
    """RMSNorm over the last axis of x. weight has shape (n_embd,)."""
    orig_shape = x.shape
    n_embd = orig_shape[-1]
    assert weight.shape == (n_embd,)

    x2d = x.reshape(-1, n_embd)          # free view; no extra HBM traffic
    rows = x2d.shape[0]
    itemsize = jnp.dtype(x.dtype).itemsize
    budget, ceiling = _vmem_budget()

    # Lane-dense repack for narrow widths (n_embd < 128 and divides 128).
    g = 128 // math.gcd(n_embd, 128)
    use_packed = (n_embd % 128 != 0 and n_embd < 128 and 128 % n_embd == 0
                  and rows % g == 0)
    # TODO(synk): widths that are neither a multiple of 128 nor a divisor of
    # 128 still use masked (vst.msk) stores on the last dim; repacking those
    # needs a gather-style relayout that is not worth it for this op.

    if use_packed:
        width = g * n_embd                       # == 128 (lane-dense)
        p_rows = rows // g
        xp = x2d.reshape(p_rows, width)          # free view (row-major)
        wp = jnp.tile(weight, g).reshape(1, width)
        seg = jnp.arange(width) // n_embd
        bmat = (seg[:, None] == seg[None, :]).astype(jnp.float32) / float(n_embd)

        if tile_rows is None:
            tile_rows = _pick_tile_rows(p_rows, width, itemsize, budget)
        grid = (pl.cdiv(p_rows, tile_rows),)

        footprint = (4 * tile_rows * width * itemsize      # dbl-buffered in+out
                     + 3 * tile_rows * width * 4            # f32 temps
                     + width * width * 4 + width * 4        # B matrix + weight
                     + (2 << 20))                           # headroom
        vmem_limit = int(min(ceiling, max(footprint, 32 << 20)))

        cost = pl.CostEstimate(
            flops=int(4 * rows * n_embd + 2 * p_rows * width * width),
            transcendentals=int(rows),
            bytes_accessed=int(2 * rows * n_embd * itemsize + width * width * 4),
        )

        out = pl.pallas_call(
            functools.partial(_rmsnorm_packed_kernel, eps=eps),
            out_shape=jax.ShapeDtypeStruct((p_rows, width), x.dtype),
            grid_spec=pltpu.PrefetchScalarGridSpec(
                num_scalar_prefetch=0,
                grid=grid,
                in_specs=[
                    pl.BlockSpec((tile_rows, width), lambda i: (i, 0)),
                    pl.BlockSpec((1, width), lambda i: (0, 0)),
                    pl.BlockSpec((width, width), lambda i: (0, 0)),
                ],
                out_specs=pl.BlockSpec((tile_rows, width), lambda i: (i, 0)),
            ),
            compiler_params=pltpu.CompilerParams(
                dimension_semantics=("parallel",),
                vmem_limit_bytes=vmem_limit,
            ),
            cost_estimate=cost,
        )(xp, wp, bmat)
        return out.reshape(orig_shape)

    # ---- plain path: n_embd is already lane-dense (or not cheaply packable) ----
    if tile_rows is None:
        tile_rows = _pick_tile_rows(rows, n_embd, itemsize, budget)
    grid = (pl.cdiv(rows, tile_rows),)
    w2d = weight.reshape(1, n_embd)

    low_precision_tail = (x.dtype == jnp.bfloat16) and _has_bf16_valu()

    footprint = (4 * tile_rows * n_embd * itemsize           # dbl-buffered in+out
                 + 3 * tile_rows * n_embd * 4                # f32 temps
                 + 2 * n_embd * 4                            # weight (+f32 copy)
                 + (2 << 20))                                # headroom
    vmem_limit = int(min(ceiling, max(footprint, 32 << 20)))

    cost = pl.CostEstimate(
        flops=int(4 * rows * n_embd),
        transcendentals=int(rows),
        bytes_accessed=int((2 * rows * n_embd + n_embd) * itemsize),
    )

    out = pl.pallas_call(
        functools.partial(_rmsnorm_kernel, eps=eps,
                          low_precision_tail=low_precision_tail),
        out_shape=jax.ShapeDtypeStruct((rows, n_embd), x.dtype),
        grid_spec=pltpu.PrefetchScalarGridSpec(
            num_scalar_prefetch=0,
            grid=grid,
            in_specs=[
                pl.BlockSpec((tile_rows, n_embd), lambda i: (i, 0)),
                pl.BlockSpec((1, n_embd), lambda i: (0, 0)),
            ],
            out_specs=pl.BlockSpec((tile_rows, n_embd), lambda i: (i, 0)),
        ),
        compiler_params=pltpu.CompilerParams(
            dimension_semantics=("parallel",),
            vmem_limit_bytes=vmem_limit,
        ),
        cost_estimate=cost,
    )(x2d, w2d)
    return out.reshape(orig_shape)


def rmsnorm_ref(x, weight, eps=1e-5):
    x32 = x.astype(jnp.float32)
    ms = jnp.mean(x32 * x32, axis=-1, keepdims=True)
    return (x32 * jax.lax.rsqrt(ms + eps) * weight.astype(jnp.float32)).astype(x.dtype)


if __name__ == "__main__":
    key = jax.random.PRNGKey(0)

    # Shape implied by the module: (batch, seq, n_embd).  n_embd=32 exercises
    # the lane-dense packed path (4 rows per 128-lane super row).
    batch, seq, n_embd = 2, 8, 32
    x = jax.random.normal(key, (batch, seq, n_embd), dtype=jnp.float32)
    weight = jnp.ones((n_embd,), dtype=jnp.float32)   # module init: ones(n_embd)

    out = jax.block_until_ready(rmsnorm(x, weight, eps=1e-5))
    ref = rmsnorm_ref(x, weight, eps=1e-5)
    assert out.shape == x.shape
    assert jnp.allclose(out, ref, atol=1e-5, rtol=1e-5)

    # Second case: plain (already lane-dense) path with a ragged row count and
    # a non-trivial weight vector.
    k1, k2 = jax.random.split(key)
    b2, s2, d2 = 3, 17, 256
    x2 = jax.random.normal(k1, (b2, s2, d2), dtype=jnp.float32)
    w2 = 1.0 + 0.1 * jax.random.normal(k2, (d2,), dtype=jnp.float32)
    out2 = jax.block_until_ready(rmsnorm(x2, w2, eps=1e-5))
    ref2 = rmsnorm_ref(x2, w2, eps=1e-5)
    assert out2.shape == x2.shape
    assert jnp.allclose(out2, ref2, atol=1e-5, rtol=1e-5)

    print("KERNEL_OK")
</pallas_src>

<mosaic_0001>
module attributes {stable_mosaic.version = 11 : i64} {
  func.func @_rmsnorm_packed_kernel(%arg0: i32, %arg1: memref<4x128xf32, #tpu.memory_space<vmem>>, %arg2: memref<1x128xf32, #tpu.memory_space<vmem>>, %arg3: memref<128x128xf32, #tpu.memory_space<vmem>>, %arg4: memref<4x128xf32, #tpu.memory_space<vmem>>) attributes {dimension_semantics = [#tpu.dimension_semantics<parallel>], iteration_bounds = array<i64: 1>, scalar_prefetch = 0 : i64, scratch_operands = 0 : i64, tpu.core_type = #tpu.core_type<tc>, window_params = [{transform_indices = @transform_0, window_bounds = array<i64: 4, 128>}, {pipeline_mode = #tpu.pipeline_mode<synchronous>, transform_indices = @transform_1, window_bounds = array<i64: 1, 128>}, {pipeline_mode = #tpu.pipeline_mode<synchronous>, transform_indices = @transform_2, window_bounds = array<i64: 128, 128>}, {transform_indices = @transform_3, window_bounds = array<i64: 4, 128>}]} {
    %c0 = arith.constant 0 : index
    %c0_0 = arith.constant 0 : index
    %0 = vector.load %arg1[%c0, %c0_0] : memref<4x128xf32, #tpu.memory_space<vmem>>, vector<4x128xf32>
    %1 = arith.mulf %0, %0 : vector<4x128xf32>
    %c0_1 = arith.constant 0 : index
    %c0_2 = arith.constant 0 : index
    %2 = vector.load %arg3[%c0_1, %c0_2] : memref<128x128xf32, #tpu.memory_space<vmem>>, vector<128x128xf32>
    %cst = arith.constant dense<0.000000e+00> : vector<4x128xf32>
    %3 = tpu.matmul %1, %2, %cst {dimension_numbers = #tpu.dot_dimension_numbers<[1], [0], [0], [1], [0, 0, 1, 1], [], []>} : vector<4x128xf32>, vector<128x128xf32>, vector<4x128xf32> -> vector<4x128xf32>
    %cst_3 = arith.constant 9.99999974E-6 : f32
    %4 = vector.broadcast %cst_3 : f32 to vector<4x128xf32>
    %5 = arith.addf %3, %4 : vector<4x128xf32>
    %6 = math.rsqrt %5 : vector<4x128xf32>
    %7 = arith.mulf %0, %6 : vector<4x128xf32>
    %c0_4 = arith.constant 0 : index
    %c0_5 = arith.constant 0 : index
    %8 = vector.load %arg2[%c0_4, %c0_5] : memref<1x128xf32, #tpu.memory_space<vmem>>, vector<1x128xf32>
    %9 = vector.broadcast %8 : vector<1x128xf32> to vector<4x128xf32>
    %10 = arith.mulf %7, %9 : vector<4x128xf32>
    %c0_6 = arith.constant 0 : index
    %c0_7 = arith.constant 0 : index
    %11 = vector.load %arg4[%c0_6, %c0_7] : memref<4x128xf32, #tpu.memory_space<vmem>>, vector<4x128xf32>
    tpu.vector_store %arg4[%c0_6, %c0_7], %10 {strides = array<i32>} : memref<4x128xf32, #tpu.memory_space<vmem>>, vector<4x128xf32>,
    return
  }
  func.func @transform_0(%arg0: i32) -> (i32, i32) {
    %c0_i32 = arith.constant 0 : i32
    %c0_i32_0 = arith.constant 0 : i32
    return %arg0, %c0_i32 : i32, i32
  }
  func.func @transform_1(%arg0: i32) -> (i32, i32) {
    %c0_i32 = arith.constant 0 : i32
    %c0_i32_0 = arith.constant 0 : i32
    %c0_i32_1 = arith.constant 0 : i32
    return %c0_i32, %c0_i32_0 : i32, i32
  }
  func.func @transform_2(%arg0: i32) -> (i32, i32) {
    %c0_i32 = arith.constant 0 : i32
    %c0_i32_0 = arith.constant 0 : i32
    %c0_i32_1 = arith.constant 0 : i32
    return %c0_i32, %c0_i32_0 : i32, i32
  }
  func.func @transform_3(%arg0: i32) -> (i32, i32) {
    %c0_i32 = arith.constant 0 : i32
    %c0_i32_0 = arith.constant 0 : i32
    return %arg0, %c0_i32 : i32, i32
  }
}

</mosaic_0001>

<bundles_post_ra>
// kernel: tpu_custom_call.1
= control target key start
LH: loop header
LB: loop body
LE: loop exit
PB: predicated region body
PF: predicated region fallthrough
CT: control target
= control target key end

     0   :  { %8 = vsyncpa [#allocation3], 0  ;;  %s389_s0 = inlined_call_operand.hbm [shape: f32[4,128], index: 0, kind: input, shape index: {}]   ;;  %s390_s1 = inlined_call_operand.vmem [shape: f32[1,128], index: 1, kind: input, shape index: {}]   ;;  %s391_s2 = inlined_call_operand.hbm [shape: f32[128,128], index: 2, kind: input, shape index: {}]   ;;  %s392_s3 = inlined_call_operand.hbm [shape: f32[4,128], index: 3, kind: output, shape index: {}]  }
   0x1   :  { %9 = vsyncpa [#allocation6], 0 }
   0x2   :  { %10 = vsyncpa [#allocation4], 0  ;;  %s315_s12 = smov [#allocation2]   ;;  %s316_s14 = smov [#allocation5]  }
   0x3   :  { %s17_s13 = sshll.u32 %s315_s12, 4  ;;  %s28_s15 = sshll.u32 %s316_s14, 4  ;;  %s18_s13 = int_to_ptr.vmem [resolvable:$true] %s17_s13  ;;  %s343_s15 = int_to_ptr.vmem [resolvable:$true] %s28_s15 }
   0x4   :  { %s243_s18 = scalar_lea.hbm %s389_s0, 64 }
   0x5   :  { %p244_p0 = scmp.ne.s32.totalorder %s389_s0, %s243_s18  ;;  %p247_p1 = scmp.lt.u32.totalorder %s243_s18, %s389_s0 }
   0x7   :  { %p249_p2 = pnand %p247_p1, %p244_p0 }
   0x9   :  { %252 = shalt.err (!%p249_p2)
}
   0xa   :  { %s253_s23 = scalar_lea.vmem %s18_s13, 64  ;;  %p258_p4 = scmp.lt.s32.totalorder %s18_s13, %s18_s13 }
   0xb   :  { %p254_p3 = scmp.ne.s32.totalorder %s18_s13, %s253_s23  ;;  %p259_p5 = scmp.lt.s32.totalorder %s253_s23, %s253_s23 }
   0xd   :  { %p260_p6 = por %p259_p5, %p258_p4 }
   0xf   :  { %p261_p7 = pnand %p260_p6, %p254_p3 }
  0x11   :  { %264 = shalt.err (!%p261_p7)
}
  0x12   :  { %20 = dma.hbm_to_vmem [thread:$0]  %s389_s0, 64, %s18_s13, [#allocation3]  }
  0x13   :  { %s265_s28 = scalar_lea.hbm %s391_s2, 2048 }
  0x14   :  { %p266_p8 = scmp.ne.s32.totalorder %s391_s2, %s265_s28  ;;  %p269_p9 = scmp.lt.u32.totalorder %s265_s28, %s391_s2 }
  0x16   :  { %p271_p10 = pnand %p269_p9, %p266_p8 }
  0x18   :  { %274 = shalt.err (!%p271_p10)
}
  0x19   :  { %s275_s6 = scalar_lea.vmem %s343_s15, 2048  ;;  %p280_p12 = scmp.lt.s32.totalorder %s343_s15, %s343_s15 }
  0x1a   :  { %p276_p11 = scmp.ne.s32.totalorder %s343_s15, %s275_s6  ;;  %p281_p13 = scmp.lt.s32.totalorder %s275_s6, %s275_s6 }
  0x1c   :  { %p282_p0 = por %p281_p13, %p280_p12 }
  0x1e   :  { %p283_p1 = pnand %p282_p0, %p276_p11 }
  0x20   :  { %286 = shalt.err (!%p283_p1)
}
  0x21   :  { %s317_s0 = smov 128   ;;  %s318_s7 = smov 8  }
  0x22   :  { %34 = dma.hbm_to_vmem [thread:$0]  %s391_s2, 2048, %s343_s15, [#allocation6], %s317_s0, %s317_s0, %s318_s7  }
  0x23   :  { %309 = dma.done.wait [#allocation3], 64  }
  0x24   :  { %310 = vsyncadd [#allocation3], 4294967232 }
  0x25   :  { %311 = dma.done.wait [#allocation6], 2048  }
  0x26   :  { %312 = vsyncadd [#allocation6], 4294965248  ;;  %v319_v0 = vmov 0.0|0.0   ;;  %vm320_vm0 = vmmov 0   ;;  %v321_v1 = vmov 0.0   ;;  %v43_v2 = vld [vmem:[#allocation5] sm:$0xff] }
  0x27   :  { %209 = vmatprep.subr.bf16.mxu0 %v319_v0  ;;  %206 = vmatprep.mubr.msk.f32.mxu0 %vm320_vm0, %v321_v1  ;;  %v44_v3 = vld [vmem:[#allocation5 + $0x8] sm:$0xff]  ;;  %v45_v4 = vld [vmem:[#allocation5 + $0x10] sm:$0xff]  ;;  %v46_v6 = vld [vmem:[#allocation5 + $0x18] sm:$0xff]  ;;  %s322_s11 = smov [#allocation7]  }
  0x28   :  { %v210_v5 = vpack.c.bf16 %v44_v3, %v43_v2  ;;  %v213_v7 = vpack.c.bf16 %v46_v6, %v45_v4  ;;  %v47_v8 = vld [vmem:[#allocation5 + $0x20] sm:$0xff]  ;;  %v48_v9 = vld [vmem:[#allocation5 + $0x28] sm:$0xff]  ;;  %v49_v11 = vld [vmem:[#allocation5 + $0x30] sm:$0xff]  ;;  %s146_s12 = sshll.u32 %s322_s11, 4  ;;  %s147_s12 = int_to_ptr.vmem [resolvable:$true] %s146_s12 }
  0x29   :  { %v216_v10 = vpack.c.bf16 %v48_v9, %v47_v8  ;;  %v50_v12 = vld [vmem:[#allocation5 + $0x38] sm:$0xff]  ;;  %v51_v14 = vld [vmem:[#allocation5 + $0x40] sm:$0xff]  ;;  %v52_v15 = vld [vmem:[#allocation5 + $0x48] sm:$0xff]  ;;  %s287_s13 = scalar_lea.vmem %s147_s12, 64  ;;  %p292_p3 = scmp.lt.s32.totalorder %s147_s12, %s147_s12 }
  0x2a   :  { %211 = vmatpush3.bf16.msra.mxu0 %v210_v5  ;;  %v219_v13 = vpack.c.bf16 %v50_v12, %v49_v11  ;;  %v222_v16 = vpack.c.bf16 %v52_v15, %v51_v14  ;;  %v53_v17 = vld [vmem:[#allocation5 + $0x50] sm:$0xff]  ;;  %v54_v18 = vld [vmem:[#allocation5 + $0x58] sm:$0xff]  ;;  %v55_v20 = vld [vmem:[#allocation5 + $0x60] sm:$0xff]  ;;  %p288_p2 = scmp.ne.s32.totalorder %s147_s12, %s287_s13  ;;  %p293_p4 = scmp.lt.s32.totalorder %s287_s13, %s287_s13 }
  0x2b   :  { %212 = vmatprep.subr.bf16.mxu0 %v319_v0  ;;  %v225_v19 = vpack.c.bf16 %v54_v18, %v53_v17  ;;  %v56_v21 = vld [vmem:[#allocation5 + $0x68] sm:$0xff]  ;;  %v57_v23 = vld [vmem:[#allocation5 + $0x70] sm:$0xff]  ;;  %v58_v24 = vld [vmem:[#allocation5 + $0x78] sm:$0xff] }
  0x2c   :  { %v228_v22 = vpack.c.bf16 %v56_v21, %v55_v20  ;;  %v231_v25 = vpack.c.bf16 %v58_v24, %v57_v23  ;;  %v41_v26 = vld [vmem:[#allocation2] sm:$0xf]  ;;  %p294_p5 = por %p293_p4, %p292_p3 }
  0x2d   :  { %v42_v27 = vmul.f32 %v41_v26, %v41_v26  ;;  %v156_v32 = vld [vmem:[%s390_s1] ss:$0 sm:$0xff] }
  0x2e   :  { %214 = vmatpush3.bf16.msra.mxu0 %v213_v7  ;;  %p295_p6 = pnand %p294_p5, %p288_p2 }
  0x2f   :  { %215 = vmatprep.subr.bf16.mxu0 %v319_v0 }
  0x32   :  { %217 = vmatpush3.bf16.msra.mxu0 %v216_v10 }
  0x33   :  { %218 = vmatprep.subr.bf16.mxu0 %v319_v0 }
  0x36   :  { %220 = vmatpush3.bf16.msra.mxu0 %v219_v13 }
  0x37   :  { %221 = vmatprep.subr.bf16.mxu0 %v319_v0 }
  0x3a   :  { %223 = vmatpush3.bf16.msra.mxu0 %v222_v16 }
  0x3b   :  { %224 = vmatprep.subr.bf16.mxu0 %v319_v0 }
  0x3e   :  { %226 = vmatpush3.bf16.msra.mxu0 %v225_v19 }
  0x3f   :  { %227 = vmatprep.subr.bf16.mxu0 %v319_v0 }
  0x42   :  { %229 = vmatpush3.bf16.msra.mxu0 %v228_v22 }
  0x43   :  { %230 = vmatprep.subr.bf16.mxu0 %v319_v0 }
  0x46   :  { %232 = vmatpush3.bf16.msra.mxu0 %v231_v25 }
  0x49   :  { %207 = vmatmul.mubr.f32.vlgmr.msra.gmra.mrb[0].mxu0 %v42_v27 }
 0x11c   :  { %v125_v28 = vpop.f32.mrb[0].mxu0 }
 0x11d   :  { %v126_v29 = vadd.f32 1e-05, %v125_v28  ;;  %v208_v30 = vpop.f32.mrb[1].mxu0 }
 0x11f   :  { %241 = vrsqrt.f32 %v126_v29 }
 0x129   :  { %v242_v31 = vpop.eup %241 }
 0x12a   :  { %v130_v33 = vmul.f32 %v242_v31, %v41_v26 }
 0x12c   :  { %v138_v34 = vmul.f32 %v156_v32, %v130_v33 }
 0x12e   :  { %139 = vst [vmem:[#allocation7] sm:$0xf] %v138_v34 }
 0x12f   :  { %298 = shalt.err (!%p295_p6)
}
 0x130   :  { %s299_s16 = scalar_lea.hbm %s392_s3, 64 }
 0x131   :  { %p300_p7 = scmp.ne.s32.totalorder %s392_s3, %s299_s16  ;;  %p303_p8 = scmp.lt.u32.totalorder %s299_s16, %s392_s3 }
 0x133   :  { %p305_p9 = pnand %p303_p8, %p300_p7 }
 0x135   :  { %308 = shalt.err (!%p305_p9)
}
 0x136   :  { %149 = dma.vmem_to_hbm [thread:$0]  %s147_s12, 64, %s392_s3, [#allocation4]  }
 0x137   :  { %313 = dma.done.wait [#allocation4], 64  }
 0x138   :  { %314 = vsyncadd [#allocation4], 4294967232 }
 0x139   :  { %153 = vsyncpa [#allocation3], 1 }
 0x13a   :  { %154 = vsyncpa [#allocation6], 1 }
 0x13b   :  { %155 = vsyncpa [#allocation4], 1 }

</bundles_post_ra>
